<compile_context>
chip_gen: v5e
topology: v5e:2x2
jax: 0.10.0
libtpu: 0.0.40
codegen_flags: <defaults>
</compile_context>

<pallas_src>
import functools
import math

import jax
import jax.numpy as jnp
from jax import lax
from jax.experimental import pallas as pl
from jax.experimental.pallas import tpu as pltpu


def _bottleneck_kernel(x_ref, w1_ref, w2_ref, out_ref, *, H, W):
    # x_ref  : (C_in, Lb)            f32, lane axis = images_per_step * H*W
    # w1_ref : (C_inter, C_in)       bf16, conv1 1x1 weight (torch [out, in])
    # w2_ref : (9, C_out, C_inter)   bf16, conv2 weight, tap-major
    # out_ref: (C_in + C_out, Lb)    f32, concat([x, conv2_out]) along channels
    HW = H * W
    Lb = x_ref.shape[1]

    x = x_ref[...]                                       # (C_in, Lb), passthrough
    xr = jnp.maximum(x, 0.0)                             # ReLU in f32

    # ---- conv1 (1x1): channels-major matmul, bf16 operands, f32 accumulate ---
    y1 = jnp.dot(w1_ref[...], xr.astype(w1_ref.dtype),
                 preferred_element_type=jnp.float32)     # (C_inter, Lb)
    y1 = jnp.maximum(y1, 0.0)

    # ---- hoisted boundary masks (per-image pixel index) ----------------------
    lane = lax.broadcasted_iota(jnp.int32, (1, Lb), 1)
    if (HW & (HW - 1)) == 0:
        pix = jnp.bitwise_and(lane, HW - 1)              # pixel index within image
    else:
        pix = lax.rem(lane, HW)
    if (W & (W - 1)) == 0:
        col = jnp.bitwise_and(pix, W - 1)                # pixel's column
    else:
        col = lax.rem(pix, W)
    row_ok = {-1: pix >= W, 0: None, 1: pix < (H - 1) * W}
    col_ok = {-1: col >= 1, 0: None, 1: col < (W - 1)}

    # ---- conv2 (3x3, pad=1): 9 accumulated matmuls over lane-rolled taps -----
    C_out = w2_ref.shape[1]
    acc = jnp.zeros((C_out, Lb), jnp.float32)
    t = 0
    for dy in (-1, 0, 1):
        for dx in (-1, 0, 1):
            off = dy * W + dx
            if off == 0:
                tap = y1
            else:
                # tap[:, p] = y1[:, p + off]  (lane roll on the XLU)
                tap = pltpu.roll(y1, shift=(-off) % Lb, axis=1)
            masks = [m for m in (row_ok[dy], col_ok[dx]) if m is not None]
            if masks:
                valid = masks[0] if len(masks) == 1 else jnp.logical_and(masks[0], masks[1])
                tap = jnp.where(valid, tap, 0.0)         # mask in f32 (v5e-safe)
            acc = acc + jnp.dot(w2_ref[t], tap.astype(w2_ref.dtype),
                                preferred_element_type=jnp.float32)
            t += 1

    # ---- channel concat [x, conv2_out]: one unmasked full-block store --------
    out_ref[...] = jnp.concatenate([x, acc], axis=0).astype(out_ref.dtype)


def bottleneck_pallas(x_nchw, w1, w2, *, images_per_step=None):
    """Bottleneck forward.

    x_nchw: (N, C_in, H, W)          PyTorch NCHW input
    w1    : (C_inter, C_in)          = conv1.weight[:, :, 0, 0]
    w2    : (C_out, C_inter, 3, 3)   = conv2.weight (PyTorch OIHW)
    returns (N, C_in + C_out, H, W)  == torch.cat((x, conv2_out), 1)
    """
    N, C_in, H, W = x_nchw.shape
    C_inter = w1.shape[0]
    C_out = w2.shape[0]
    C_total = C_in + C_out
    HW = H * W

    # Images fused per grid step: amortize per-step overhead / keep lanes >=128,
    # but keep >= 2 "parallel" grid steps when N allows (v7x has 2 TensorCores).
    if images_per_step is None:
        images_per_step = max(1, N // 2)
        images_per_step = max(images_per_step, -(-128 // HW))   # lane dim >= 128
        images_per_step = min(images_per_step, N)
    if (images_per_step * HW) % 128 != 0 and images_per_step != N:
        images_per_step = N                     # full-extent block is always legal

    steps = pl.cdiv(N, images_per_step)
    N_pad = steps * images_per_step
    if N_pad != N:
        x_nchw = jnp.pad(x_nchw, ((0, N_pad - N), (0, 0), (0, 0), (0, 0)))

    Lb = images_per_step * HW
    L = N_pad * HW

    # Channels-major over (N*H*W): batch and pixels on the lane axis.
    x_cm = jnp.transpose(x_nchw, (1, 0, 2, 3)).reshape(C_in, L)
    # Weights cast to bf16 once; conv2 weight reordered tap-major:
    #   w2_taps[t, o, i] = w2[o, i, kh, kw] with t = kh*3 + kw.
    w1_bf = w1.astype(jnp.bfloat16)
    w2_taps = jnp.transpose(w2, (2, 3, 0, 1)).reshape(9, C_out, C_inter)
    w2_taps = w2_taps.astype(jnp.bfloat16)

    kernel = functools.partial(_bottleneck_kernel, H=H, W=W)

    out_cm = pl.pallas_call(
        kernel,
        out_shape=jax.ShapeDtypeStruct((C_total, L), x_nchw.dtype),
        grid_spec=pltpu.PrefetchScalarGridSpec(
            num_scalar_prefetch=0,
            grid=(steps,),
            in_specs=[
                pl.BlockSpec((C_in, Lb), lambda i: (0, i)),
                pl.BlockSpec((C_inter, C_in), lambda i: (0, 0)),
                pl.BlockSpec((9, C_out, C_inter), lambda i: (0, 0, 0)),
            ],
            out_specs=pl.BlockSpec((C_total, Lb), lambda i: (0, i)),
        ),
        compiler_params=pltpu.CompilerParams(
            dimension_semantics=("parallel",)),
    )(x_cm, w1_bf, w2_taps)

    out = out_cm.reshape(C_total, N_pad, H, W).transpose(1, 0, 2, 3)
    return out[:N]


def bottleneck_ref(x, w1_torch, w2_torch):
    """Pure-JAX NCHW reference matching the PyTorch module."""
    h = jnp.maximum(x, 0.0)
    y1 = lax.conv_general_dilated(
        h, w1_torch, window_strides=(1, 1), padding="VALID",
        dimension_numbers=("NCHW", "OIHW", "NCHW"),
        precision=lax.Precision.HIGHEST)
    y1 = jnp.maximum(y1, 0.0)
    y2 = lax.conv_general_dilated(
        y1, w2_torch, window_strides=(1, 1), padding=((1, 1), (1, 1)),
        dimension_numbers=("NCHW", "OIHW", "NCHW"),
        precision=lax.Precision.HIGHEST)
    return jnp.concatenate([x, y2], axis=1)


if __name__ == "__main__":
    # Module config (small): nChannels=4, growthRate=4 -> interChannels=16
    nChannels, growthRate = 4, 4
    interChannels = 4 * growthRate
    N, H, W = 2, 16, 16

    key = jax.random.PRNGKey(0)
    kx, k1, k2 = jax.random.split(key, 3)

    x = jax.random.normal(kx, (N, nChannels, H, W), dtype=jnp.float32)

    # Kaiming-uniform-like init with PyTorch Conv2d weight shapes:
    #   conv1.weight: (interChannels, nChannels, 1, 1)
    #   conv2.weight: (growthRate, interChannels, 3, 3)
    b1 = 1.0 / math.sqrt(nChannels * 1 * 1)
    b2 = 1.0 / math.sqrt(interChannels * 3 * 3)
    w1_torch = jax.random.uniform(k1, (interChannels, nChannels, 1, 1),
                                  jnp.float32, -b1, b1)
    w2_torch = jax.random.uniform(k2, (growthRate, interChannels, 3, 3),
                                  jnp.float32, -b2, b2)

    w1 = w1_torch[:, :, 0, 0]                     # (C_inter, C_in)

    out = bottleneck_pallas(x, w1, w2_torch)
    out = jax.block_until_ready(out)

    ref = bottleneck_ref(x, w1_torch, w2_torch)
    assert out.shape == (N, nChannels + growthRate, H, W)
    # bf16 MXU operands with f32 accumulation -> relaxed tolerance
    # (the x passthrough in the concat stays bit-exact).
    assert jnp.allclose(out, ref, atol=2e-2, rtol=2e-2), "mismatch vs reference"

    print("KERNEL_OK")
</pallas_src>

<mosaic_0001>
module attributes {stable_mosaic.version = 11 : i64} {
  func.func @_bottleneck_kernel(%arg0: i32, %arg1: memref<4x256xf32, #tpu.memory_space<vmem>>, %arg2: memref<16x4xbf16, #tpu.memory_space<vmem>>, %arg3: memref<9x4x16xbf16, #tpu.memory_space<vmem>>, %arg4: memref<8x256xf32, #tpu.memory_space<vmem>>) attributes {dimension_semantics = [#tpu.dimension_semantics<parallel>], iteration_bounds = array<i64: 2>, scalar_prefetch = 0 : i64, scratch_operands = 0 : i64, tpu.core_type = #tpu.core_type<tc>, window_params = [{transform_indices = @transform_0, window_bounds = array<i64: 4, 256>}, {pipeline_mode = #tpu.pipeline_mode<synchronous>, transform_indices = @transform_1, window_bounds = array<i64: 16, 4>}, {pipeline_mode = #tpu.pipeline_mode<synchronous>, transform_indices = @transform_2, window_bounds = array<i64: 9, 4, 16>}, {transform_indices = @transform_3, window_bounds = array<i64: 8, 256>}]} {
    %c0 = arith.constant 0 : index
    %c0_0 = arith.constant 0 : index
    %0 = vector.load %arg1[%c0, %c0_0] : memref<4x256xf32, #tpu.memory_space<vmem>>, vector<4x256xf32>
    %cst = arith.constant 0.000000e+00 : f32
    %1 = vector.broadcast %cst : f32 to vector<4x256xf32>
    %2 = arith.maximumf %0, %1 : vector<4x256xf32>
    %c0_1 = arith.constant 0 : index
    %c0_2 = arith.constant 0 : index
    %3 = vector.load %arg2[%c0_1, %c0_2] : memref<16x4xbf16, #tpu.memory_space<vmem>>, vector<16x4xbf16>
    %4 = arith.truncf %2 : vector<4x256xf32> to vector<4x256xbf16>
    %cst_3 = arith.constant dense<0.000000e+00> : vector<16x256xf32>
    %5 = tpu.matmul %3, %4, %cst_3 {dimension_numbers = #tpu.dot_dimension_numbers<[1], [0], [0], [1], [0, 0, 1, 1], [], []>} : vector<16x4xbf16>, vector<4x256xbf16>, vector<16x256xf32> -> vector<16x256xf32>
    %cst_4 = arith.constant 0.000000e+00 : f32
    %6 = vector.broadcast %cst_4 : f32 to vector<16x256xf32>
    %7 = arith.maximumf %5, %6 : vector<16x256xf32>
    %8 = tpu.iota {dimensions = array<i32: 1>} : vector<1x256xi32>
    %c255_i32 = arith.constant 255 : i32
    %9 = vector.broadcast %c255_i32 : i32 to vector<1x256xi32>
    %10 = arith.andi %8, %9 : vector<1x256xi32>
    %c15_i32 = arith.constant 15 : i32
    %11 = vector.broadcast %c15_i32 : i32 to vector<1x256xi32>
    %12 = arith.andi %10, %11 : vector<1x256xi32>
    %c16_i32 = arith.constant 16 : i32
    %13 = vector.broadcast %c16_i32 : i32 to vector<1x256xi32>
    %14 = arith.cmpi sge, %10, %13 : vector<1x256xi32>
    %c240_i32 = arith.constant 240 : i32
    %15 = vector.broadcast %c240_i32 : i32 to vector<1x256xi32>
    %16 = arith.cmpi slt, %10, %15 : vector<1x256xi32>
    %c1_i32 = arith.constant 1 : i32
    %17 = vector.broadcast %c1_i32 : i32 to vector<1x256xi32>
    %18 = arith.cmpi sge, %12, %17 : vector<1x256xi32>
    %c15_i32_5 = arith.constant 15 : i32
    %19 = vector.broadcast %c15_i32_5 : i32 to vector<1x256xi32>
    %20 = arith.cmpi slt, %12, %19 : vector<1x256xi32>
    %cst_6 = arith.constant 0.000000e+00 : f32
    %21 = vector.broadcast %cst_6 : f32 to vector<4x256xf32>
    %c17_i32 = arith.constant 17 : i32
    %22 = tpu.dynamic_rotate %7 by %c17_i32 dim 1 : vector<16x256xf32>, i32 -> vector<16x256xf32>
    %23 = arith.andi %14, %18 : vector<1x256xi1>
    %cst_7 = arith.constant 0.000000e+00 : f32
    %24 = vector.shape_cast %23 : vector<1x256xi1> to vector<1x256xi1>
    %25 = vector.broadcast %24 : vector<1x256xi1> to vector<16x256xi1>
    %26 = vector.broadcast %cst_7 : f32 to vector<16x256xf32>
    %27 = arith.select %25, %22, %26 : vector<16x256xi1>, vector<16x256xf32>
    %c0_8 = arith.constant 0 : index
    %c0_9 = arith.constant 0 : index
    %c0_10 = arith.constant 0 : index
    %28 = vector.load %arg3[%c0_8, %c0_9, %c0_10] : memref<9x4x16xbf16, #tpu.memory_space<vmem>>, vector<1x4x16xbf16>
    %29 = vector.shape_cast %28 : vector<1x4x16xbf16> to vector<4x16xbf16>
    %30 = arith.truncf %27 : vector<16x256xf32> to vector<16x256xbf16>
    %cst_11 = arith.constant dense<0.000000e+00> : vector<4x256xf32>
    %31 = tpu.matmul %29, %30, %cst_11 {dimension_numbers = #tpu.dot_dimension_numbers<[1], [0], [0], [1], [0, 0, 1, 1], [], []>} : vector<4x16xbf16>, vector<16x256xbf16>, vector<4x256xf32> -> vector<4x256xf32>
    %32 = arith.addf %21, %31 : vector<4x256xf32>
    %c16_i32_12 = arith.constant 16 : i32
    %33 = tpu.dynamic_rotate %7 by %c16_i32_12 dim 1 : vector<16x256xf32>, i32 -> vector<16x256xf32>
    %cst_13 = arith.constant 0.000000e+00 : f32
    %34 = vector.shape_cast %14 : vector<1x256xi1> to vector<1x256xi1>
    %35 = vector.broadcast %34 : vector<1x256xi1> to vector<16x256xi1>
    %36 = vector.broadcast %cst_13 : f32 to vector<16x256xf32>
    %37 = arith.select %35, %33, %36 : vector<16x256xi1>, vector<16x256xf32>
    %c1 = arith.constant 1 : index
    %c0_14 = arith.constant 0 : index
    %c0_15 = arith.constant 0 : index
    %38 = vector.load %arg3[%c1, %c0_14, %c0_15] : memref<9x4x16xbf16, #tpu.memory_space<vmem>>, vector<1x4x16xbf16>
    %39 = vector.shape_cast %38 : vector<1x4x16xbf16> to vector<4x16xbf16>
    %40 = arith.truncf %37 : vector<16x256xf32> to vector<16x256xbf16>
    %cst_16 = arith.constant dense<0.000000e+00> : vector<4x256xf32>
    %41 = tpu.matmul %39, %40, %cst_16 {dimension_numbers = #tpu.dot_dimension_numbers<[1], [0], [0], [1], [0, 0, 1, 1], [], []>} : vector<4x16xbf16>, vector<16x256xbf16>, vector<4x256xf32> -> vector<4x256xf32>
    %42 = arith.addf %32, %41 : vector<4x256xf32>
    %c15_i32_17 = arith.constant 15 : i32
    %43 = tpu.dynamic_rotate %7 by %c15_i32_17 dim 1 : vector<16x256xf32>, i32 -> vector<16x256xf32>
    %44 = arith.andi %14, %20 : vector<1x256xi1>
    %cst_18 = arith.constant 0.000000e+00 : f32
    %45 = vector.shape_cast %44 : vector<1x256xi1> to vector<1x256xi1>
    %46 = vector.broadcast %45 : vector<1x256xi1> to vector<16x256xi1>
    %47 = vector.broadcast %cst_18 : f32 to vector<16x256xf32>
    %48 = arith.select %46, %43, %47 : vector<16x256xi1>, vector<16x256xf32>
    %c2 = arith.constant 2 : index
    %c0_19 = arith.constant 0 : index
    %c0_20 = arith.constant 0 : index
    %49 = vector.load %arg3[%c2, %c0_19, %c0_20] : memref<9x4x16xbf16, #tpu.memory_space<vmem>>, vector<1x4x16xbf16>
    %50 = vector.shape_cast %49 : vector<1x4x16xbf16> to vector<4x16xbf16>
    %51 = arith.truncf %48 : vector<16x256xf32> to vector<16x256xbf16>
    %cst_21 = arith.constant dense<0.000000e+00> : vector<4x256xf32>
    %52 = tpu.matmul %50, %51, %cst_21 {dimension_numbers = #tpu.dot_dimension_numbers<[1], [0], [0], [1], [0, 0, 1, 1], [], []>} : vector<4x16xbf16>, vector<16x256xbf16>, vector<4x256xf32> -> vector<4x256xf32>
    %53 = arith.addf %42, %52 : vector<4x256xf32>
    %c1_i32_22 = arith.constant 1 : i32
    %54 = tpu.dynamic_rotate %7 by %c1_i32_22 dim 1 : vector<16x256xf32>, i32 -> vector<16x256xf32>
    %cst_23 = arith.constant 0.000000e+00 : f32
    %55 = vector.shape_cast %18 : vector<1x256xi1> to vector<1x256xi1>
    %56 = vector.broadcast %55 : vector<1x256xi1> to vector<16x256xi1>
    %57 = vector.broadcast %cst_23 : f32 to vector<16x256xf32>
    %58 = arith.select %56, %54, %57 : vector<16x256xi1>, vector<16x256xf32>
    %c3 = arith.constant 3 : index
    %c0_24 = arith.constant 0 : index
    %c0_25 = arith.constant 0 : index
    %59 = vector.load %arg3[%c3, %c0_24, %c0_25] : memref<9x4x16xbf16, #tpu.memory_space<vmem>>, vector<1x4x16xbf16>
    %60 = vector.shape_cast %59 : vector<1x4x16xbf16> to vector<4x16xbf16>
    %61 = arith.truncf %58 : vector<16x256xf32> to vector<16x256xbf16>
    %cst_26 = arith.constant dense<0.000000e+00> : vector<4x256xf32>
    %62 = tpu.matmul %60, %61, %cst_26 {dimension_numbers = #tpu.dot_dimension_numbers<[1], [0], [0], [1], [0, 0, 1, 1], [], []>} : vector<4x16xbf16>, vector<16x256xbf16>, vector<4x256xf32> -> vector<4x256xf32>
    %63 = arith.addf %53, %62 : vector<4x256xf32>
    %c4 = arith.constant 4 : index
    %c0_27 = arith.constant 0 : index
    %c0_28 = arith.constant 0 : index
    %64 = vector.load %arg3[%c4, %c0_27, %c0_28] : memref<9x4x16xbf16, #tpu.memory_space<vmem>>, vector<1x4x16xbf16>
    %65 = vector.shape_cast %64 : vector<1x4x16xbf16> to vector<4x16xbf16>
    %66 = arith.truncf %7 : vector<16x256xf32> to vector<16x256xbf16>
    %cst_29 = arith.constant dense<0.000000e+00> : vector<4x256xf32>
    %67 = tpu.matmul %65, %66, %cst_29 {dimension_numbers = #tpu.dot_dimension_numbers<[1], [0], [0], [1], [0, 0, 1, 1], [], []>} : vector<4x16xbf16>, vector<16x256xbf16>, vector<4x256xf32> -> vector<4x256xf32>
    %68 = arith.addf %63, %67 : vector<4x256xf32>
    %c255_i32_30 = arith.constant 255 : i32
    %69 = tpu.dynamic_rotate %7 by %c255_i32_30 dim 1 : vector<16x256xf32>, i32 -> vector<16x256xf32>
    %cst_31 = arith.constant 0.000000e+00 : f32
    %70 = vector.shape_cast %20 : vector<1x256xi1> to vector<1x256xi1>
    %71 = vector.broadcast %70 : vector<1x256xi1> to vector<16x256xi1>
    %72 = vector.broadcast %cst_31 : f32 to vector<16x256xf32>
    %73 = arith.select %71, %69, %72 : vector<16x256xi1>, vector<16x256xf32>
    %c5 = arith.constant 5 : index
    %c0_32 = arith.constant 0 : index
    %c0_33 = arith.constant 0 : index
    %74 = vector.load %arg3[%c5, %c0_32, %c0_33] : memref<9x4x16xbf16, #tpu.memory_space<vmem>>, vector<1x4x16xbf16>
    %75 = vector.shape_cast %74 : vector<1x4x16xbf16> to vector<4x16xbf16>
    %76 = arith.truncf %73 : vector<16x256xf32> to vector<16x256xbf16>
    %cst_34 = arith.constant dense<0.000000e+00> : vector<4x256xf32>
    %77 = tpu.matmul %75, %76, %cst_34 {dimension_numbers = #tpu.dot_dimension_numbers<[1], [0], [0], [1], [0, 0, 1, 1], [], []>} : vector<4x16xbf16>, vector<16x256xbf16>, vector<4x256xf32> -> vector<4x256xf32>
    %78 = arith.addf %68, %77 : vector<4x256xf32>
    %c241_i32 = arith.constant 241 : i32
    %79 = tpu.dynamic_rotate %7 by %c241_i32 dim 1 : vector<16x256xf32>, i32 -> vector<16x256xf32>
    %80 = arith.andi %16, %18 : vector<1x256xi1>
    %cst_35 = arith.constant 0.000000e+00 : f32
    %81 = vector.shape_cast %80 : vector<1x256xi1> to vector<1x256xi1>
    %82 = vector.broadcast %81 : vector<1x256xi1> to vector<16x256xi1>
    %83 = vector.broadcast %cst_35 : f32 to vector<16x256xf32>
    %84 = arith.select %82, %79, %83 : vector<16x256xi1>, vector<16x256xf32>
    %c6 = arith.constant 6 : index
    %c0_36 = arith.constant 0 : index
    %c0_37 = arith.constant 0 : index
    %85 = vector.load %arg3[%c6, %c0_36, %c0_37] : memref<9x4x16xbf16, #tpu.memory_space<vmem>>, vector<1x4x16xbf16>
    %86 = vector.shape_cast %85 : vector<1x4x16xbf16> to vector<4x16xbf16>
    %87 = arith.truncf %84 : vector<16x256xf32> to vector<16x256xbf16>
    %cst_38 = arith.constant dense<0.000000e+00> : vector<4x256xf32>
    %88 = tpu.matmul %86, %87, %cst_38 {dimension_numbers = #tpu.dot_dimension_numbers<[1], [0], [0], [1], [0, 0, 1, 1], [], []>} : vector<4x16xbf16>, vector<16x256xbf16>, vector<4x256xf32> -> vector<4x256xf32>
    %89 = arith.addf %78, %88 : vector<4x256xf32>
    %c240_i32_39 = arith.constant 240 : i32
    %90 = tpu.dynamic_rotate %7 by %c240_i32_39 dim 1 : vector<16x256xf32>, i32 -> vector<16x256xf32>
    %cst_40 = arith.constant 0.000000e+00 : f32
    %91 = vector.shape_cast %16 : vector<1x256xi1> to vector<1x256xi1>
    %92 = vector.broadcast %91 : vector<1x256xi1> to vector<16x256xi1>
    %93 = vector.broadcast %cst_40 : f32 to vector<16x256xf32>
    %94 = arith.select %92, %90, %93 : vector<16x256xi1>, vector<16x256xf32>
    %c7 = arith.constant 7 : index
    %c0_41 = arith.constant 0 : index
    %c0_42 = arith.constant 0 : index
    %95 = vector.load %arg3[%c7, %c0_41, %c0_42] : memref<9x4x16xbf16, #tpu.memory_space<vmem>>, vector<1x4x16xbf16>
    %96 = vector.shape_cast %95 : vector<1x4x16xbf16> to vector<4x16xbf16>
    %97 = arith.truncf %94 : vector<16x256xf32> to vector<16x256xbf16>
    %cst_43 = arith.constant dense<0.000000e+00> : vector<4x256xf32>
    %98 = tpu.matmul %96, %97, %cst_43 {dimension_numbers = #tpu.dot_dimension_numbers<[1], [0], [0], [1], [0, 0, 1, 1], [], []>} : vector<4x16xbf16>, vector<16x256xbf16>, vector<4x256xf32> -> vector<4x256xf32>
    %99 = arith.addf %89, %98 : vector<4x256xf32>
    %c239_i32 = arith.constant 239 : i32
    %100 = tpu.dynamic_rotate %7 by %c239_i32 dim 1 : vector<16x256xf32>, i32 -> vector<16x256xf32>
    %101 = arith.andi %16, %20 : vector<1x256xi1>
    %cst_44 = arith.constant 0.000000e+00 : f32
    %102 = vector.shape_cast %101 : vector<1x256xi1> to vector<1x256xi1>
    %103 = vector.broadcast %102 : vector<1x256xi1> to vector<16x256xi1>
    %104 = vector.broadcast %cst_44 : f32 to vector<16x256xf32>
    %105 = arith.select %103, %100, %104 : vector<16x256xi1>, vector<16x256xf32>
    %c8 = arith.constant 8 : index
    %c0_45 = arith.constant 0 : index
    %c0_46 = arith.constant 0 : index
    %106 = vector.load %arg3[%c8, %c0_45, %c0_46] : memref<9x4x16xbf16, #tpu.memory_space<vmem>>, vector<1x4x16xbf16>
    %107 = vector.shape_cast %106 : vector<1x4x16xbf16> to vector<4x16xbf16>
    %108 = arith.truncf %105 : vector<16x256xf32> to vector<16x256xbf16>
    %cst_47 = arith.constant dense<0.000000e+00> : vector<4x256xf32>
    %109 = tpu.matmul %107, %108, %cst_47 {dimension_numbers = #tpu.dot_dimension_numbers<[1], [0], [0], [1], [0, 0, 1, 1], [], []>} : vector<4x16xbf16>, vector<16x256xbf16>, vector<4x256xf32> -> vector<4x256xf32>
    %110 = arith.addf %99, %109 : vector<4x256xf32>
    %111 = tpu.concatenate %0, %110 in 0 : vector<4x256xf32>, vector<4x256xf32> -> vector<8x256xf32>
    %c0_48 = arith.constant 0 : index
    %c0_49 = arith.constant 0 : index
    %112 = vector.load %arg4[%c0_48, %c0_49] : memref<8x256xf32, #tpu.memory_space<vmem>>, vector<8x256xf32>
    tpu.vector_store %arg4[%c0_48, %c0_49], %111 {strides = array<i32>} : memref<8x256xf32, #tpu.memory_space<vmem>>, vector<8x256xf32>,
    return
  }
  func.func @transform_0(%arg0: i32) -> (i32, i32) {
    %c0_i32 = arith.constant 0 : i32
    %c0_i32_0 = arith.constant 0 : i32
    return %c0_i32, %arg0 : i32, i32
  }
  func.func @transform_1(%arg0: i32) -> (i32, i32) {
    %c0_i32 = arith.constant 0 : i32
    %c0_i32_0 = arith.constant 0 : i32
    %c0_i32_1 = arith.constant 0 : i32
    return %c0_i32, %c0_i32_0 : i32, i32
  }
  func.func @transform_2(%arg0: i32) -> (i32, i32, i32) {
    %c0_i32 = arith.constant 0 : i32
    %c0_i32_0 = arith.constant 0 : i32
    %c0_i32_1 = arith.constant 0 : i32
    %c0_i32_2 = arith.constant 0 : i32
    return %c0_i32, %c0_i32_0, %c0_i32_1 : i32, i32, i32
  }
  func.func @transform_3(%arg0: i32) -> (i32, i32) {
    %c0_i32 = arith.constant 0 : i32
    %c0_i32_0 = arith.constant 0 : i32
    return %c0_i32, %arg0 : i32, i32
  }
}

</mosaic_0001>

<bundles_post_ra>
// kernel: tpu_custom_call.1
= control target key start
LH: loop header
LB: loop body
LE: loop exit
PB: predicated region body
PF: predicated region fallthrough
CT: control target
= control target key end

     0   :  { %8 = vsyncpa [#allocation3], 0  ;;  %s1622_s0 = inlined_call_operand.hbm [shape: f32[4,512], index: 0, kind: input, shape index: {}]   ;;  %s1623_s1 = inlined_call_operand.vmem [shape: bf16[16,4], index: 1, kind: input, shape index: {}]   ;;  %s1624_s2 = inlined_call_operand.hbm [shape: bf16[9,4,16], index: 2, kind: input, shape index: {}]   ;;  %s1625_s3 = inlined_call_operand.hbm [shape: f32[8,512], index: 3, kind: output, shape index: {}]  }
   0x1   :  { %10 = vsyncpa [#allocation3 + $0x1], 0 }
   0x2   :  { %11 = vsyncpa [#allocation6], 0 }
   0x3   :  { %12 = vsyncpa [#allocation4], 0 }
   0x4   :  { %14 = vsyncpa [#allocation4 + $0x1], 0  ;;  %s1280_s12 = smov 0   ;;  %s1282_s13 = smov 0  }
   0x5   :  { %s1284_s14 = smov 0   ;;  %s1286_s15 = smov 0  }
   0x6 LB: > { %s133_s18 = sshll.u32 %s1624_s2, 4  ;;  %s1304_s19 = sadd.s32 4294967295, %s1247_s15   ;;  %s1247_s15 = sphi %s1286_s15, %s1655_s15   ;;  %s1243_s14 = sphi %s1284_s14, %s1654_s14   ;;  %s1239_s13 = sphi %s1282_s13, %s1653_s13   ;;  %s1235_s12 = sphi %s1280_s12, %s1652_s12   ;;  %s134_s18 = int_to_ptr.hbm [resolvable:$true] %s133_s18 }
   0x7   : > { %p886_p0 = scmp.ge.s32.totalorder %s1247_s15, 1  ;;  %p41_p1 = scmp.eq.s32.totalorder %s1304_s19, 0 }
   0x8   : > { %p119_p2 = scmp.lt.s32.totalorder %s1247_s15, 3  ;;  %s1249_s21 = smov [#allocation5]  }
   0x9   : > { %s135_s22 = sshll.u32 %s1249_s21, 4  ;;  %s1250_s23 = smov 32   ;;  %s136_s22 = int_to_ptr.vmem [resolvable:$true] %s135_s22 }
   0xa   : > { %p1309_p3 = pnand %p886_p0, %p119_p2  ;;  %s1251_s24 = smov 2  }
   0xb   : > { %s885_s25 = sadd.s32 4294967294, %s1247_s15   ;;  %s1320_s26 = sadd.s32 1, %s1247_s15  }
   0xc   : > { %p978_p4 = pneg %p1309_p3  ;;  %s27_s27 = sadd.s32 1, %s1243_s14 }
   0xd   : > { %s24_s28 = ssub.s32 %s1247_s15, %s1320_s26  ;;  %p34_p7 = scmp.ne.s32.totalorder %s1243_s14, %s1239_s13 }
   0xe   : > { %p979_p6 = pnand %p978_p4, %p41_p1  ;;  %p25_p8 = scmp.eq.s32.totalorder %s24_s28, 0 }
   0xf   : > { %p35_p9 = scmp.eq.s32.totalorder %s1247_s15, 0  ;;  %p40_p10 = scmp.ne.s32.totalorder %s1239_s13, %s1235_s12 }
  0x10   : > { %981 = dma.hbm_to_vmem [thread:$0]  (!%p979_p6), %s134_s18, 288, %s136_s22, [#allocation6], %s1250_s23, %s1250_s23, %s1251_s24  }
  0x11   : > { %p106_p11 = scmp.eq.s32.totalorder %s1304_s19, 1  ;;  %p1336_p12 = por %p41_p1, %p40_p10 }
  0x12   : > { %s1332_s29 = scalar_select %p25_p8, %s1243_s14, %s27_s27  }
  0x13   : > { %p1340_p13 = por %p106_p11, %p34_p7  ;;  %p112_p0 = scmp.eq.s32.totalorder %s885_s25, 1 }
  0x14   : > { %p36_p2 = por %p35_p9, %p34_p7  ;;  %s149_s5 = sand.u32 1, %s1243_s14  }
  0x15   : > { %p1345_p4 = por %p112_p0, %p40_p10  ;;  %p991_p6 = scmp.lt.s32.totalorder %s1247_s15, 2 }
  0x16   : > { %s889_s7 = sshll.u32 %s149_s5, 3  ;;  %s967_s8 = sshll.u32 %s1247_s15, 3 }
  0x17   : > { %s158_s11 = scalar_lea.hbm %s1622_s0, %s967_s8  ;;  %s153_s17 = scalar_lea.vmem [#allocation2], %s889_s7 }
  0x18   : > { %s160_s16 = sshll.u32 %s158_s11, 4  ;;  %s162_s18 = sshll.u32 %s153_s17, 4  ;;  %s161_s16 = int_to_ptr.hbm [resolvable:$true] %s160_s16  ;;  %s163_s18 = int_to_ptr.vmem [resolvable:$true] %s162_s18 }
  0x19   : > { %p1354_p8 = pnand %p991_p6, %p36_p2  ;;  %s150_s22 = scalar_lea.sflag [#allocation3], %s149_s5 }
  0x1a   : > { %s1147_s23 = sshra.s32 %s161_s16, 4  ;;  %s1154_s28 = scalar_lea.hbm %s1622_s0, 16  ;;  %s1148_s23 = int_to_ptr.hbm [resolvable:$true] %s1147_s23 }
  0x1b   : > { %s1149_s24 = scalar_lea.hbm %s1148_s23, 8  ;;  %p1151_p9 = pneg %p1354_p8 }
  0x1c   : > { %p1150_p7 = scmp.ne.s32.totalorder %s1148_s23, %s1149_s24  ;;  %p1155_p0 = scmp.lt.s32.totalorder %s1148_s23, %s1622_s0 }
  0x1d   : > { %p1156_p2 = scmp.lt.s32.totalorder %s1154_s28, %s1149_s24 }
  0x1e   : > { %p1152_p10 = pnand %p1151_p9, %p1150_p7 }
  0x1f   : > { %p1157_p6 = por %p1156_p2, %p1155_p0 }
  0x20   : > { %p1153_p11 = pneg %p1152_p10 }
  0x22   : > { %p1158_p5 = pnand %p1157_p6, %p1153_p11 }
  0x24   : > { %1161 = shalt.err (!%p1158_p5)
}
  0x25   : > { %985 = dma.hbm_to_vmem [thread:$0]  (!%p1354_p8), %s161_s16, 128, %s163_s18, %s150_s22  }
  0x26   : > { %171 = sbr.rel (%p1309_p3) target bundleno = 539 (0x21b), region = 32  ;;  %s1371_s5 = sand.u32 (!%p1309_p3), 1, %s1239_s13  }
  0x27   : > { %s893_s9 = sshll.u32 (!%p1309_p3), %s1371_s5, 3  ;;  %s174_s10 = scalar_lea.sflag (!%p1309_p3), [#allocation3], %s1371_s5 }
  0x28   : > { %s177_s11 = scalar_lea.vmem (!%p1309_p3), [#allocation2], %s893_s9 }
  0x2b   : > { %1222 = dma.done.wait (%p1336_p12), %s174_s10, 128  }
  0x2c   : > { %1224 = vsyncadd (%p1336_p12), %s174_s10, 4294967168 }
  0x2d   : > { %1226 = dma.done.wait (%p41_p1), [#allocation6], 288  }
  0x2e   : > { %1228 = vsyncadd (%p41_p1), [#allocation6], 4294967008  ;;  %v209_v0 = vld [vmem:[%s177_s11] sm:$0xff]  ;;  %vm230_vm0 = vcmask 1041408   ;;  %v968_v8 = vld [vmem:[%s1623_s1] sm:$0xff]  ;;  %vm226_vm1 = vcmask 31744   ;;  %v269_v21 = vlaneseq }
  0x2f   : > { %v210_v1 = vmax.f32 %v209_v0, 0.0  ;;  %s1252_s16 = smov 17   ;;  %s1253_s17 = smov 15   ;;  %v307_v43 = vld [vmem:[#allocation5] sm:$0x3]  ;;  %vm335_vm9 = vcmask 130048  }
  0x30   : > { %s1254_s18 = smov 16   ;;  %s1255_s21 = smov 113   ;;  %v1390_v22 = vand.u32 127, %v269_v21 }
  0x31   : > { %214 = vst [vmem:[#allocation1] ss:$2 sm:$0xff] %v210_v1  ;;  %s1256_s22 = smov 1   ;;  %s1257_s23 = smov 127  }
  0x32   : > { %s1258_s24 = smov 112   ;;  %s1259_s25 = smov 111   ;;  %v272_v23 = vand.u32 255, %v1390_v22  ;;  %v1394_v24 = vadd.s32 128, %v1390_v22  ;;  %vm292_vm5 = vcmp.lt.s32.totalorder %v1390_v22, 17  ;;  %vm318_vm11 = vcmp.lt.s32.totalorder %v1390_v22, 16 }
  0x33   : > { %vm402_vm12 = vcmp.lt.s32.totalorder %v1390_v22, 15  ;;  %s895_s27 = sshll.u32 %s1371_s5, 4  ;;  %s969_s28 = sshll.u32 %s1304_s19, 4 }
  0x34   : > { %v1396_v26 = vand.u32 15, %v272_v23  ;;  %v273_v27 = vand.u32 255, %v1394_v24  ;;  %vm1399_vm2 = vcmp.ge.s32.totalorder %v272_v23, 16  ;;  %s800_s9 = scalar_lea.hbm %s1625_s3, %s969_s28  ;;  %s205_s10 = scalar_lea.vmem [#allocation7], %s895_s27 }
  0x35   : > { %vm902_vm15 = vmpackc.low %vm1399_vm2, %vm1399_vm2  ;;  %s802_s11 = sshll.u32 %s205_s10, 4  ;;  %s804_s20 = sshll.u32 %s800_s9, 4  ;;  %s803_s11 = int_to_ptr.vmem [resolvable:$true] %s802_s11  ;;  %s805_s20 = int_to_ptr.hbm [resolvable:$true] %s804_s20 }
  0x36   : > { %vm280_vm3 = vcmp.ge.s32.totalorder %v1396_v26, 1  ;;  %v1406_v29 = vand.u32 15, %v273_v27  ;;  %vm282_vm10 = vcmp.lt.s32.totalorder %v1396_v26, 15  ;;  %s789_s19 = scalar_lea.sflag [#allocation4], %s1371_s5  ;;  %s1191_s30 = sshra.s32 %s805_s20, 4  ;;  %s1192_s30 = int_to_ptr.hbm [resolvable:$true] %s1191_s30 }
  0x37   : > { %vm1412_vm4 = vmand %vm1399_vm2, %vm280_vm3  ;;  %p1198_p12 = scmp.lt.s32.totalorder %s1192_s30, %s1625_s3 }
  0x38   : > { %v215_v2 = vld.sshfl [vmem:[#allocation1] sm:$0xff pattern:$0x75316420]  ;;  %v216_v3 = vld.sshfl [vmem:[#allocation1 + $0x8] sm:$0xff pattern:$0x75316420]  ;;  %vm907_vm7 = vmpackc.low %vm1412_vm4, %vm1412_vm4 }
  0x39   : > { %v219_v4 = vpack.c.bf16 %v215_v2, %v215_v2  ;;  %v220_v5 = vpack.c.bf16 %v216_v3, %v216_v3  ;;  %772 = vst [vmem:[#allocation1] ss:$2 sm:$0xff] %v209_v0  ;;  %vm281_vm6 = vcmp.ge.s32.totalorder %v1406_v29, 1  ;;  %vm283_vm13 = vcmp.lt.s32.totalorder %v1406_v29, 15  ;;  %vm1440_vm14 = vmand %vm1399_vm2, %vm282_vm10 }
  0x3a   : > { %vm1424_vm8 = vmpackc.low %vm281_vm6, %vm281_vm6  ;;  %vm460_vm4 = vcmp.lt.s32.totalorder %v1390_v22, 1 }
  0x3b   : > { %v232_v6 = vsel %vm230_vm0, %v219_v4, 0  ;;  %v235_v7 = vsel %vm230_vm0, %v220_v5, 0  ;;  %vm915_vm0 = vmpackc.low %vm1440_vm14, %vm1440_vm14 }
  0x3c   : > { %244 = vmatpush.bf16.msra.mxu0 %v232_v6  ;;  %258 = vmatpush.bf16.msra.mxu1 %v235_v7  ;;  %v332_v7 = vld [vmem:[#allocation5 + $0x2] sm:$0x3]  ;;  %vm1490_vm2 = vmpackc.low %vm280_vm3, %vm280_vm3  ;;  %vm1500_vm3 = vcmp.lt.s32.totalorder %v273_v27, 240 }
  0x3d   : > { %vm950_vm14 = vmpackc.low %vm1500_vm3, %vm1500_vm3 }
  0x3f   : > { %900 = vmatmul.msk.bf16.vlgmr.msra.gmra.mxu0 %vm226_vm1, %v968_v8  ;;  %901 = vmatmul.msk.bf16.vlgmr.msra.gmra.mxu1 %vm226_vm1, %v968_v8  ;;  %vm1471_vm1 = vmpackc.low %vm283_vm13, %vm283_vm13 }
  0xbc   : > { %v246_v9 = vpop.f32.mrf.mxu0  ;;  %v260_v10 = vpop.f32.mrf.mxu1 }
  0xbd   : > { %v265_v13 = vmax.f32 %v246_v9, 0.0  ;;  %v266_v15 = vmax.f32 %v260_v10, 0.0 }
  0xc4   : > { %v248_v11 = vpop.f32.mrf.mxu0  ;;  %v262_v12 = vpop.f32.mrf.mxu1 }
  0xc5   : > { %v267_v14 = vmax.f32 %v248_v11, 0.0  ;;  %v268_v16 = vmax.f32 %v262_v12, 0.0 }
  0xc7   : > { %v1057_v17 = vpack.i.bf16 %v267_v14, %v265_v13  ;;  %v1386_v18 = vpack.c.bf16 %v267_v14, %v265_v13  ;;  %v1388_v19 = vpack.c.bf16 %v268_v16, %v266_v15  ;;  %v1062_v20 = vpack.i.bf16 %v268_v16, %v266_v15  ;;  %v737_v14 = vld [vmem:[#allocation5 + $0x10] sm:$0x3] }
  0xc9   : > { %1058 = vrot.lane.b32.xlu2 %v1057_v17, %s1252_s16  ;;  %1048 = vrot.lane.b32.xlu1 %v1057_v17, %s1253_s17 }
  0xca   : > { %1038 = vrot.lane.b32.xlu0 %v1057_v17, %s1254_s18 }
  0xd1   : > { %1063 = vrot.lane.b32.xlu2 %v1062_v20, %s1252_s16  ;;  %1053 = vrot.lane.b32.xlu1 %v1062_v20, %s1253_s17  ;;  %s1193_s16 = scalar_lea.hbm %s1192_s30, 16 }
  0xd2   : > { %1043 = vrot.lane.b32.xlu0 %v1062_v20, %s1254_s18  ;;  %p1194_p1 = scmp.ne.s32.totalorder %s1192_s30, %s1193_s16 }
  0xd4   : > { %p1195_p3 = pnand %p1194_p1, %p1340_p13 }
  0xd6   : > { %p1196_p5 = pneg %p1195_p3 }
  0xd9   : > { %1078 = vrot.lane.b32.xlu2 %v1057_v17, %s1255_s21  ;;  %1073 = vrot.lane.b32.xlu1 %v1062_v20, %s1256_s22 }
  0xda   : > { %1068 = vrot.lane.b32.xlu0 %v1057_v17, %s1256_s22 }
  0xe1   : > { %1093 = vrot.lane.b32.xlu2 %v1062_v20, %s1257_s23  ;;  %1088 = vrot.lane.b32.xlu1 %v1057_v17, %s1257_s23 }
  0xe2   : > { %1083 = vrot.lane.b32.xlu0 %v1062_v20, %s1255_s21  ;;  %s1197_s21 = scalar_lea.hbm %s1625_s3, 32 }
  0xe3   : > { %p1199_p8 = scmp.lt.s32.totalorder %s1197_s21, %s1193_s16 }
  0xe5   : > { %p1200_p7 = por %p1199_p8, %p1198_p12 }
  0xe7   : > { %p1201_p9 = pnand %p1200_p7, %p1196_p5 }
  0xe9   : > { %1108 = vrot.lane.b32.xlu2 %v1057_v17, %s1258_s24  ;;  %1103 = vrot.lane.b32.xlu1 %v1062_v20, %s1259_s25 }
  0xea   : > { %1098 = vrot.lane.b32.xlu0 %v1057_v17, %s1259_s25 }
  0xf2   : > { %1113 = vrot.lane.b32.xlu0 %v1062_v20, %s1258_s24 }
 0x123   : > { %v1059_v25 = vpop.permute.xlu2 %1058 }
 0x124   : > { %v1061_v32 = vunpack.i.h.bf16 %v1059_v25  ;;  %v1060_v33 = vunpack.i.l.bf16 %v1059_v25 }
 0x12b   : > { %v1064_v31 = vpop.permute.xlu2 %1063 }
 0x12c   : > { %v1066_v34 = vunpack.i.h.bf16 %v1064_v31  ;;  %v1065_v35 = vunpack.i.l.bf16 %v1064_v31 }
 0x12e   : > { %v295_v36 = vsel %vm292_vm5, %v1065_v35, %v1060_v33  ;;  %v296_v37 = vsel %vm292_vm5, %v1066_v34, %v1061_v32  ;;  %v293_v38 = vsel %vm292_vm5, %v1060_v33, %v1065_v35  ;;  %v294_v39 = vsel %vm292_vm5, %v1061_v32, %v1066_v34 }
 0x12f   : > { %v908_v41 = vpack.c.bf16 %v296_v37, %v295_v36  ;;  %v912_v42 = vpack.c.bf16 %v294_v39, %v293_v38  ;;  %vm551_vm5 = vcmp.lt.s32.totalorder %v1390_v22, 127 }
 0x131   : > { %909 = vmatpush.bf16.msk.msrb.mxu0 %vm907_vm7, %v908_v41  ;;  %913 = vmatpush.bf16.msk.msrb.mxu1 %vm1424_vm8, %v912_v42  ;;  %vm607_vm7 = vcmp.lt.s32.totalorder %v1390_v22, 113 }
 0x133   : > { %v1455_v61 = vpop.permute.xlu2 %1078 }
 0x134   : > { %910 = vmatmul.msk.bf16.vlgmr.msrb.gmra.mxu0 %vm335_vm9, %v307_v43  ;;  %914 = vmatmul.msk.bf16.vlgmr.msrb.gmra.mxu1 %vm335_vm9, %v307_v43  ;;  %v1081_v35 = vunpack.i.h.bf16 %v1455_v61  ;;  %v1080_v41 = vunpack.i.l.bf16 %v1455_v61 }
 0x13b   : > { %v1049_v44 = vpop.permute.xlu1 %1048  ;;  %v1094_v25 = vpop.permute.xlu2 %1093 }
 0x13c   : > { %v1039_v45 = vpop.permute.xlu0 %1038  ;;  %v1051_v47 = vunpack.i.h.bf16 %v1049_v44  ;;  %v1050_v48 = vunpack.i.l.bf16 %v1049_v44  ;;  %v1096_v30 = vunpack.i.h.bf16 %v1094_v25  ;;  %v1095_v31 = vunpack.i.l.bf16 %v1094_v25 }
 0x13d   : > { %v1041_v53 = vunpack.i.h.bf16 %v1039_v45  ;;  %v1040_v54 = vunpack.i.l.bf16 %v1039_v45 }
 0x143   : > { %v1054_v46 = vpop.permute.xlu1 %1053  ;;  %v1109_v52 = vpop.permute.xlu2 %1108 }
 0x144   : > { %v1056_v49 = vunpack.i.h.bf16 %v1054_v46  ;;  %v1055_v50 = vunpack.i.l.bf16 %v1054_v46  ;;  %v1044_v51 = vpop.permute.xlu0 %1043 }
 0x145   : > { %v1046_v55 = vunpack.i.h.bf16 %v1044_v51  ;;  %v1045_v56 = vunpack.i.l.bf16 %v1044_v51 }
 0x146   : > { %v405_v57 = vsel %vm402_vm12, %v1055_v50, %v1050_v48  ;;  %v406_v58 = vsel %vm402_vm12, %v1056_v49, %v1051_v47  ;;  %v403_v59 = vsel %vm402_vm12, %v1050_v48, %v1055_v50  ;;  %v404_v60 = vsel %vm402_vm12, %v1051_v47, %v1056_v49  ;;  %v418_v48 = vld [vmem:[#allocation5 + $0x4] sm:$0x3] }
 0x147   : > { %v321_v62 = vsel %vm318_vm11, %v1045_v56, %v1040_v54  ;;  %v322_v63 = vsel %vm318_vm11, %v1046_v55, %v1041_v53  ;;  %v319_v0 = vsel %vm318_vm11, %v1040_v54, %v1045_v56  ;;  %v320_v1 = vsel %vm318_vm11, %v1041_v53, %v1046_v55  ;;  %v565_v54 = vld [vmem:[#allocation5 + $0xa] sm:$0x3] }
 0x148   : > { %v903_v2 = vpack.c.bf16 %v322_v63, %v321_v62  ;;  %v334_v3 = vpack.c.bf16 %v320_v1, %v319_v0  ;;  %v916_v4 = vpack.c.bf16 %v406_v58, %v405_v57  ;;  %v920_v6 = vpack.c.bf16 %v404_v60, %v403_v59 }
 0x149   : > { %vm665_vm11 = vcmp.lt.s32.totalorder %v1390_v22, 112  ;;  %v1111_v55 = vunpack.i.h.bf16 %v1109_v52  ;;  %v1110_v56 = vunpack.i.l.bf16 %v1109_v52  ;;  %vm721_vm12 = vcmp.lt.s32.totalorder %v1390_v22, 111  ;;  %v509_v22 = vld [vmem:[#allocation5 + $0x8] sm:$0x3] }
 0x14a   : > { %904 = vmatpush.bf16.msk.msra.mxu2 %vm902_vm15, %v903_v2  ;;  %359 = vmatpush.bf16.msra.mxu3 %v334_v3  ;;  %vm1571_vm15 = vmand %vm1500_vm3, %vm283_vm13 }
 0x14b   : > { %v1074_v8 = vpop.permute.xlu1 %1073 }
 0x14c   : > { %v1076_v9 = vunpack.i.h.bf16 %v1074_v8  ;;  %v1075_v10 = vunpack.i.l.bf16 %v1074_v8  ;;  %v1069_v11 = vpop.permute.xlu0 %1068 }
 0x14d   : > { %v1071_v12 = vunpack.i.h.bf16 %v1069_v11  ;;  %v1070_v13 = vunpack.i.l.bf16 %v1069_v11  ;;  %905 = vmatmul.msk.bf16.vlgmr.msra.gmra.mxu2 %vm335_vm9, %v332_v7  ;;  %906 = vmatmul.msk.bf16.vlgmr.msra.gmra.mxu3 %vm335_vm9, %v332_v7 }
 0x14e   : > { %917 = vmatpush.bf16.msk.msrb.mxu2 %vm915_vm0, %v916_v4  ;;  %921 = vmatpush.bf16.msk.msrb.mxu3 %vm1471_vm1, %v920_v6  ;;  %vm958_vm0 = vmpackc.low %vm1571_vm15, %vm1571_vm15  ;;  %v774_v4 = vld.sshfl [vmem:[#allocation1 + $0x8] sm:$0xff pattern:$0x75316420] }
 0x14f   : > { %v462_v15 = vsel %vm460_vm4, %v1071_v12, %v1076_v9  ;;  %v464_v16 = vsel %vm460_vm4, %v1076_v9, %v1071_v12  ;;  %v461_v17 = vsel %vm460_vm4, %v1070_v13, %v1075_v10  ;;  %v463_v20 = vsel %vm460_vm4, %v1075_v10, %v1070_v13  ;;  %v679_v12 = vld [vmem:[#allocation5 + $0xe] sm:$0x3]  ;;  %v623_v13 = vld [vmem:[#allocation5 + $0xc] sm:$0x3] }
 0x150   : > { %v924_v21 = vpack.c.bf16 %v464_v16, %v463_v20  ;;  %v928_v23 = vpack.c.bf16 %v462_v15, %v461_v17 }
 0x152   : > { %522 = vmatpush.bf16.msra.mxu2 %v1386_v18  ;;  %535 = vmatpush.bf16.msra.mxu3 %v1388_v19  ;;  %v474_v18 = vld [vmem:[#allocation5 + $0x6] sm:$0x3] }
 0x153   : > { %925 = vmatpush.bf16.msk.msra.mxu0 %vm1490_vm2, %v924_v21  ;;  %929 = vmatpush.bf16.msk.msra.mxu1 %vm1424_vm8, %v928_v23  ;;  %v1089_v28 = vpop.permute.xlu1 %1088  ;;  %vm1512_vm8 = vmpackc.low %vm282_vm10, %vm282_vm10 }
 0x154   : > { %v1091_v32 = vunpack.i.h.bf16 %v1089_v28  ;;  %v1090_v33 = vunpack.i.l.bf16 %v1089_v28  ;;  %v1084_v34 = vpop.permute.xlu0 %1083  ;;  %vm1529_vm10 = vmand %vm1500_vm3, %vm281_vm6 }
 0x155   : > { %v1086_v36 = vunpack.i.h.bf16 %v1084_v34  ;;  %v1085_v37 = vunpack.i.l.bf16 %v1084_v34  ;;  %vm945_vm6 = vmpackc.low %vm1529_vm10, %vm1529_vm10 }
 0x156   : > { %926 = vmatmul.msk.bf16.vlgmr.msra.gmra.mxu0 %vm335_vm9, %v474_v18  ;;  %930 = vmatmul.msk.bf16.vlgmr.msra.gmra.mxu1 %vm335_vm9, %v474_v18  ;;  %v553_v27 = vsel %vm551_vm5, %v1091_v32, %v1096_v30  ;;  %v555_v38 = vsel %vm551_vm5, %v1096_v30, %v1091_v32  ;;  %v552_v39 = vsel %vm551_vm5, %v1090_v33, %v1095_v31 }
 0x157   : > { %v554_v40 = vsel %vm551_vm5, %v1095_v31, %v1090_v33  ;;  %v934_v26 = vpack.c.bf16 %v553_v27, %v552_v39  ;;  %v609_v44 = vsel %vm607_vm7, %v1081_v35, %v1086_v36  ;;  %v611_v45 = vsel %vm607_vm7, %v1086_v36, %v1081_v35 }
 0x158   : > { %v938_v42 = vpack.c.bf16 %v555_v38, %v554_v40  ;;  %v608_v46 = vsel %vm607_vm7, %v1080_v41, %v1085_v37  ;;  %v610_v47 = vsel %vm607_vm7, %v1085_v37, %v1080_v41 }
 0x159   : > { %935 = vmatpush.bf16.msk.msrb.mxu0 %vm1512_vm8, %v934_v26  ;;  %v942_v49 = vpack.c.bf16 %v609_v44, %v608_v46  ;;  %v946_v50 = vpack.c.bf16 %v611_v45, %v610_v47 }
 0x15a   : > { %939 = vmatpush.bf16.msk.msrb.mxu1 %vm1471_vm1, %v938_v42 }
 0x15b   : > { %v1104_v53 = vpop.permute.xlu1 %1103 }
 0x15c   : > { %v1099_v51 = vpop.permute.xlu0 %1098  ;;  %v1106_v57 = vunpack.i.h.bf16 %v1104_v53  ;;  %v1105_v58 = vunpack.i.l.bf16 %v1104_v53 }
 0x15d   : > { %918 = vmatmul.msk.bf16.vlgmr.msrb.gmra.mxu2 %vm335_vm9, %v418_v48  ;;  %922 = vmatmul.msk.bf16.vlgmr.msrb.gmra.mxu3 %vm335_vm9, %v418_v48  ;;  %v1101_v60 = vunpack.i.h.bf16 %v1099_v51  ;;  %v1100_v61 = vunpack.i.l.bf16 %v1099_v51 }
 0x15e   : > { %943 = vmatpush.bf16.msk.msrb.mxu2 %vm1490_vm2, %v942_v49  ;;  %947 = vmatpush.bf16.msk.msrb.mxu3 %vm945_vm6, %v946_v50 }
 0x15f   : > { %v723_v7 = vsel %vm721_vm12, %v1101_v60, %v1106_v57  ;;  %v725_v8 = vsel %vm721_vm12, %v1106_v57, %v1101_v60  ;;  %v722_v9 = vsel %vm721_vm12, %v1100_v61, %v1105_v58  ;;  %v724_v10 = vsel %vm721_vm12, %v1105_v58, %v1100_v61 }
 0x160   : > { %v955_v29 = vpack.c.bf16 %v723_v7, %v722_v9  ;;  %v959_v11 = vpack.c.bf16 %v725_v8, %v724_v10 }
 0x164   : > { %v1114_v59 = vpop.permute.xlu0 %1113 }
 0x165   : > { %v1116_v62 = vunpack.i.h.bf16 %v1114_v59  ;;  %v1115_v63 = vunpack.i.l.bf16 %v1114_v59 }
 0x166   : > { %936 = vmatmul.msk.bf16.vlgmr.msrb.gmra.mxu0 %vm335_vm9, %v565_v54  ;;  %940 = vmatmul.msk.bf16.vlgmr.msrb.gmra.mxu1 %vm335_vm9, %v565_v54 }
 0x167   : > { %v667_v0 = vsel %vm665_vm11, %v1111_v55, %v1116_v62  ;;  %v669_v1 = vsel %vm665_vm11, %v1116_v62, %v1111_v55  ;;  %v666_v2 = vsel %vm665_vm11, %v1110_v56, %v1115_v63  ;;  %v668_v3 = vsel %vm665_vm11, %v1115_v63, %v1110_v56 }
 0x168   : > { %v680_v5 = vpack.c.bf16 %v667_v0, %v666_v2  ;;  %v951_v6 = vpack.c.bf16 %v669_v1, %v668_v3  ;;  %v773_v2 = vld.sshfl [vmem:[#allocation1] sm:$0xff pattern:$0x75316420] }
 0x16a   : > { %692 = vmatpush.bf16.msra.mxu0 %v680_v5  ;;  %952 = vmatpush.bf16.msk.msra.mxu1 %vm950_vm14, %v951_v6 }
 0x16d   : > { %931 = vmatmul.msk.bf16.vlgmr.msra.gmra.mxu2 %vm335_vm9, %v509_v22  ;;  %932 = vmatmul.msk.bf16.vlgmr.msra.gmra.mxu3 %vm335_vm9, %v509_v22 }
 0x16e   : > { %956 = vmatpush.bf16.msk.msra.mxu2 %vm1512_vm8, %v955_v29  ;;  %960 = vmatpush.bf16.msk.msra.mxu3 %vm958_vm0, %v959_v11 }
 0x176   : > { %949 = vmatmul.msk.bf16.vlgmr.msra.gmra.mxu0 %vm335_vm9, %v679_v12  ;;  %953 = vmatmul.msk.bf16.vlgmr.msra.gmra.mxu1 %vm335_vm9, %v679_v12 }
 0x17d   : > { %944 = vmatmul.msk.bf16.vlgmr.msrb.gmra.mxu2 %vm335_vm9, %v623_v13  ;;  %948 = vmatmul.msk.bf16.vlgmr.msrb.gmra.mxu3 %vm335_vm9, %v623_v13 }
 0x18d   : > { %957 = vmatmul.msk.bf16.vlgmr.msra.gmra.mxu2 %vm335_vm9, %v737_v14  ;;  %961 = vmatmul.msk.bf16.vlgmr.msra.gmra.mxu3 %vm335_vm9, %v737_v14  ;;  %vm783_vm9 = vcmask 1043456  }
 0x1b1   : > { %v377_v15 = vpop.f32.mrf.mxu0  ;;  %v390_v16 = vpop.f32.mrf.mxu1 }
 0x1b9   : > { %v379_v17 = vpop.f32.mrf.mxu0  ;;  %v392_v20 = vpop.f32.mrf.mxu1 }
 0x1d0   : > { %v348_v21 = vpop.f32.mrf.mxu2  ;;  %v361_v23 = vpop.f32.mrf.mxu3 }
 0x1d1   : > { %v378_v45 = vadd.f32 %v377_v15, %v348_v21  ;;  %v391_v46 = vadd.f32 %v390_v16, %v361_v23 }
 0x1d3   : > { %v489_v25 = vpop.f32.mrf.mxu0  ;;  %v502_v18 = vpop.f32.mrf.mxu1 }
 0x1d8   : > { %v350_v19 = vpop.f32.mrf.mxu2  ;;  %v363_v28 = vpop.f32.mrf.mxu3 }
 0x1db   : > { %v491_v30 = vpop.f32.mrf.mxu0  ;;  %v504_v31 = vpop.f32.mrf.mxu1 }
 0x1e0   : > { %v433_v32 = vpop.f32.mrf.mxu2  ;;  %v446_v33 = vpop.f32.mrf.mxu3 }
 0x1e1   : > { %v450_v47 = vadd.f32 %v433_v32, %v378_v45  ;;  %v451_v48 = vadd.f32 %v446_v33, %v391_v46 }
 0x1e3   : > { %v580_v34 = vpop.f32.mrf.mxu0  ;;  %v593_v35 = vpop.f32.mrf.mxu1  ;;  %v506_v51 = vadd.f32 %v489_v25, %v450_v47  ;;  %v507_v52 = vadd.f32 %v502_v18, %v451_v48 }
 0x1e8   : > { %v435_v36 = vpop.f32.mrf.mxu2  ;;  %v448_v37 = vpop.f32.mrf.mxu3 }
 0x1eb   : > { %v582_v24 = vpop.f32.mrf.mxu0  ;;  %v595_v27 = vpop.f32.mrf.mxu1 }
 0x1f0   : > { %v524_v38 = vpop.f32.mrf.mxu2  ;;  %v537_v39 = vpop.f32.mrf.mxu3 }
 0x1f1   : > { %v541_v53 = vadd.f32 %v524_v38, %v506_v51  ;;  %v542_v54 = vadd.f32 %v537_v39, %v507_v52 }
 0x1f3   : > { %v694_v40 = vpop.f32.mrf.mxu0  ;;  %v707_v41 = vpop.f32.mrf.mxu1  ;;  %v597_v57 = vadd.f32 %v580_v34, %v541_v53  ;;  %v598_v58 = vadd.f32 %v593_v35, %v542_v54 }
 0x1f8   : > { %v526_v26 = vpop.f32.mrf.mxu2  ;;  %v539_v42 = vpop.f32.mrf.mxu3 }
 0x1fb   : > { %v696_v43 = vpop.f32.mrf.mxu0  ;;  %v709_v44 = vpop.f32.mrf.mxu1 }
 0x200   : > { %v638_v49 = vpop.f32.mrf.mxu2  ;;  %v651_v50 = vpop.f32.mrf.mxu3 }
 0x201   : > { %v655_v59 = vadd.f32 %v638_v49, %v597_v57  ;;  %v656_v60 = vadd.f32 %v651_v50, %v598_v58 }
 0x203   : > { %v711_v61 = vadd.f32 %v694_v40, %v655_v59  ;;  %v712_v62 = vadd.f32 %v707_v41, %v656_v60 }
 0x208   : > { %v640_v55 = vpop.f32.mrf.mxu2  ;;  %v653_v56 = vpop.f32.mrf.mxu3 }
 0x210   : > { %v752_v63 = vpop.f32.mrf.mxu2  ;;  %v765_v0 = vpop.f32.mrf.mxu3 }
 0x211   : > { %v769_v1 = vadd.f32 %v752_v63, %v711_v61  ;;  %v770_v3 = vadd.f32 %v765_v0, %v712_v62 }
 0x213   : > { %v779_v5 = vrot.slane %v769_v1, 4  ;;  %v780_v6 = vrot.slane %v770_v3, 4 }
 0x215   : > { %v784_v7 = vsel %vm783_vm9, %v773_v2, %v779_v5  ;;  %v785_v8 = vsel %vm783_vm9, %v774_v4, %v780_v6 }
 0x216   : > { %786 = vst [vmem:[%s205_s10] sm:$0xff] %v784_v7 }
 0x217   : > { %787 = vst [vmem:[%s205_s10 + $0x8] sm:$0xff] %v785_v8 }
 0x218   : > { %v754_v9 = vpop.f32.mrf.mxu2  ;;  %v767_v10 = vpop.f32.mrf.mxu3 }
 0x219   : > { %1204 = shalt.err (!%p1201_p9)
}
 0x21a   : > { %976 = dma.vmem_to_hbm [thread:$0]  (%p1340_p13), %s803_s11, 256, %s805_s20, %s789_s19  }
 0x21b PF: > { %s816_s5 = sand.u32 1, %s1235_s12   ;;  %p1651_p10 = scmp.ge.s32.totalorder %s1247_s15, 2 }
 0x21c   : > { %s817_s24 = scalar_lea.sflag [#allocation4], %s816_s5 }
 0x21d   : > { %p987_p11 = pnand %p1651_p10, %p1345_p4 }
 0x21f   : > { %p988_p0 = pneg %p987_p11 }
 0x221   : > { %1230 = dma.done.wait (%p988_p0), %s817_s24, 256  }
 0x222   : > { %1232 = vsyncadd (%p988_p0), %s817_s24, 4294967040  ;;  %p17_p2 = scmp.ge.s32.totalorder %s1320_s26, 4   ;;  %s1652_s12 = smov %s1239_s13 }
 0x223   : > { %s1653_s13 = smov %s1243_s14  ;;  %s1654_s14 = smov %s1332_s29 }
 0x224   : > { %s1655_s15 = smov %s1320_s26  ;;  %19 = sbr.rel (!%p17_p2) target bundleno = 6 (0x6), region = 89 }
 0x229   :  { %823 = vsyncpa [#allocation3], 1 }
 0x22a   :  { %825 = vsyncpa [#allocation3 + $0x1], 1 }
 0x22b   :  { %826 = vsyncpa [#allocation6], 1 }
 0x22c   :  { %827 = vsyncpa [#allocation4], 1 }
 0x22d   :  { %829 = vsyncpa [#allocation4 + $0x1], 1 }

</bundles_post_ra>
